<compile_context>
chip_gen: v6e
topology: v6e:2x2x1
jax: 0.10.0
libtpu: 0.0.40
codegen_flags: <defaults>
</compile_context>

<pallas_src>
import math

import jax
import jax.numpy as jnp
from jax.experimental import pallas as pl
from jax.experimental.pallas import tpu as pltpu


def _concat_kernel(*refs):
    """Copy each input block into its static lane-slice of the output block.

    All refs are 2-D blocks of shape (tile_lead, width_i); widths and offsets
    are static Python ints, so every store is a static contiguous lane-range.
    """
    *in_refs, out_ref = refs
    off = 0
    for r in in_refs:
        w = r.shape[-1]
        out_ref[:, off:off + w] = r[...]
        off += w


def pallas_concat(xs, dimension=1):
    """Concatenate a list/tuple of arrays along `dimension` with a Pallas kernel."""
    xs = [jnp.asarray(x) for x in xs]
    if not xs:
        raise ValueError("Concat needs at least one input")
    ndim = xs[0].ndim
    axis = dimension % ndim

    # torch.cat semantics: ranks and all non-concat dims must match.
    base = xs[0].shape
    for x in xs:
        if x.ndim != ndim:
            raise ValueError("all inputs must have the same rank")
        for a in range(ndim):
            if a != axis and x.shape[a] != base[a]:
                raise ValueError("non-concat dims must match")

    # Explicit dtype promotion in the wrapper (torch.cat-style promotion),
    # rather than a silent cast inside the kernel store.
    out_dtype = jnp.result_type(*[x.dtype for x in xs])
    xs = [x.astype(out_dtype) for x in xs]

    # ---- Lane-dense 2-D view: (lead, C_i * tail) -----------------------------
    lead = math.prod(base[:axis])
    tail = math.prod(base[axis + 1:])
    widths = [x.shape[axis] * tail for x in xs]
    total_w = sum(widths)
    xs2d = [x.reshape(lead, w) for x, w in zip(xs, widths)]

    out_dims = list(base)
    out_dims[axis] = sum(x.shape[axis] for x in xs)

    # ---- Tile the leading dim, budgeted for the smallest VMEM (v7x) ----------
    itemsize = jnp.dtype(out_dtype).itemsize
    bytes_per_lead_row = 2 * total_w * itemsize        # inputs (sum) + output row
    double_buffered = 2 * bytes_per_lead_row           # BlockSpec double-buffers
    vmem_budget = 24 * 1024 * 1024                     # stay well under 32 MiB scoped
    if lead <= 8:
        tile_lead = lead                               # "full dim" escape of (8,128) rule
    else:
        t = max(8, min(lead, vmem_budget // max(1, double_buffered)))
        tile_lead = (t // 8) * 8                       # sublane-aligned tile
    grid = (pl.cdiv(lead, tile_lead),)

    in_specs = [pl.BlockSpec((tile_lead, w), lambda n: (n, 0)) for w in widths]
    out_specs = pl.BlockSpec((tile_lead, total_w), lambda n: (n, 0))

    total_bytes = sum(x.size for x in xs2d) * itemsize
    out2d = pl.pallas_call(
        _concat_kernel,
        out_shape=jax.ShapeDtypeStruct((lead, total_w), out_dtype),
        grid=grid,
        in_specs=in_specs,
        out_specs=out_specs,
        compiler_params=pltpu.CompilerParams(
            dimension_semantics=("parallel",),        # shard copy across v7x's 2 TCs
            vmem_limit_bytes=32 * 1024 * 1024,
        ),
        cost_estimate=pl.CostEstimate(
            flops=0, transcendentals=0, bytes_accessed=2 * total_bytes
        ),
    )(*xs2d)

    return out2d.reshape(out_dims)


class Concat:
    """JAX/Pallas equivalent of the PyTorch Concat module."""

    def __init__(self, dimension=1, source=(-1,)):
        self.d = dimension
        self.source = source  # bookkeeping only (used by the surrounding graph)

    def __call__(self, x):
        # x: list/tuple of arrays, same shape except along self.d
        return pallas_concat(x, self.d)


if __name__ == "__main__":
    key = jax.random.PRNGKey(0)
    k1, k2, k3 = jax.random.split(key, 3)

    # NCHW feature maps with different channel counts (typical skip-concat).
    x1 = jax.random.normal(k1, (2, 4, 16, 16), dtype=jnp.float32)
    x2 = jax.random.normal(k2, (2, 6, 16, 16), dtype=jnp.float32)
    x3 = jax.random.normal(k3, (2, 4, 16, 16), dtype=jnp.float32)

    module = Concat(dimension=1, source=[-1, -2, -3])
    out = jax.block_until_ready(module([x1, x2, x3]))

    ref = jnp.concatenate([x1, x2, x3], axis=1)
    assert out.shape == ref.shape == (2, 14, 16, 16)
    assert out.dtype == ref.dtype
    assert jnp.array_equal(out, ref)

    print("KERNEL_OK")
</pallas_src>

<mosaic_0001>
module attributes {stable_mosaic.version = 11 : i64} {
  func.func @_concat_kernel(%arg0: i32, %arg1: memref<2x1024xf32, #tpu.memory_space<vmem>>, %arg2: memref<2x1536xf32, #tpu.memory_space<vmem>>, %arg3: memref<2x1024xf32, #tpu.memory_space<vmem>>, %arg4: memref<2x3584xf32, #tpu.memory_space<vmem>>) attributes {dimension_semantics = [#tpu.dimension_semantics<parallel>], iteration_bounds = array<i64: 1>, scalar_prefetch = 0 : i64, scratch_operands = 0 : i64, tpu.core_type = #tpu.core_type<tc>, window_params = [{transform_indices = @transform_0, window_bounds = array<i64: 2, 1024>}, {transform_indices = @transform_1, window_bounds = array<i64: 2, 1536>}, {transform_indices = @transform_2, window_bounds = array<i64: 2, 1024>}, {transform_indices = @transform_3, window_bounds = array<i64: 2, 3584>}]} {
    %c0 = arith.constant 0 : index
    %c0_0 = arith.constant 0 : index
    %0 = vector.load %arg1[%c0, %c0_0] : memref<2x1024xf32, #tpu.memory_space<vmem>>, vector<2x1024xf32>
    %c0_1 = arith.constant 0 : index
    %c0_2 = arith.constant 0 : index
    %1 = vector.load %arg4[%c0_1, %c0_2] : memref<2x3584xf32, #tpu.memory_space<vmem>>, vector<2x1024xf32>
    tpu.vector_store %arg4[%c0_1, %c0_2], %0 {strides = array<i32>} : memref<2x3584xf32, #tpu.memory_space<vmem>>, vector<2x1024xf32>,
    %c0_3 = arith.constant 0 : index
    %c0_4 = arith.constant 0 : index
    %2 = vector.load %arg2[%c0_3, %c0_4] : memref<2x1536xf32, #tpu.memory_space<vmem>>, vector<2x1536xf32>
    %c0_5 = arith.constant 0 : index
    %c1024 = arith.constant 1024 : index
    %3 = vector.load %arg4[%c0_5, %c1024] : memref<2x3584xf32, #tpu.memory_space<vmem>>, vector<2x1536xf32>
    tpu.vector_store %arg4[%c0_5, %c1024], %2 {strides = array<i32>} : memref<2x3584xf32, #tpu.memory_space<vmem>>, vector<2x1536xf32>,
    %c0_6 = arith.constant 0 : index
    %c0_7 = arith.constant 0 : index
    %4 = vector.load %arg3[%c0_6, %c0_7] : memref<2x1024xf32, #tpu.memory_space<vmem>>, vector<2x1024xf32>
    %c0_8 = arith.constant 0 : index
    %c2560 = arith.constant 2560 : index
    %5 = vector.load %arg4[%c0_8, %c2560] : memref<2x3584xf32, #tpu.memory_space<vmem>>, vector<2x1024xf32>
    tpu.vector_store %arg4[%c0_8, %c2560], %4 {strides = array<i32>} : memref<2x3584xf32, #tpu.memory_space<vmem>>, vector<2x1024xf32>,
    return
  }
  func.func @transform_0(%arg0: i32) -> (i32, i32) {
    %c0_i32 = arith.constant 0 : i32
    %c0_i32_0 = arith.constant 0 : i32
    return %arg0, %c0_i32 : i32, i32
  }
  func.func @transform_1(%arg0: i32) -> (i32, i32) {
    %c0_i32 = arith.constant 0 : i32
    %c0_i32_0 = arith.constant 0 : i32
    return %arg0, %c0_i32 : i32, i32
  }
  func.func @transform_2(%arg0: i32) -> (i32, i32) {
    %c0_i32 = arith.constant 0 : i32
    %c0_i32_0 = arith.constant 0 : i32
    return %arg0, %c0_i32 : i32, i32
  }
  func.func @transform_3(%arg0: i32) -> (i32, i32) {
    %c0_i32 = arith.constant 0 : i32
    %c0_i32_0 = arith.constant 0 : i32
    return %arg0, %c0_i32 : i32, i32
  }
}

</mosaic_0001>

<bundles_post_ra>
// kernel: tpu_custom_call.1
= control target key start
LH: loop header
LB: loop body
LE: loop exit
PB: predicated region body
PF: predicated region fallthrough
CT: control target
= control target key end

     0   :  { %8 = vsyncpa [#allocation3], 0  ;;  %s206_s0 = inlined_call_operand.hbm [shape: f32[2,1024], index: 0, kind: input, shape index: {}]   ;;  %s207_s1 = inlined_call_operand.hbm [shape: f32[2,1536], index: 1, kind: input, shape index: {}]   ;;  %s208_s2 = inlined_call_operand.hbm [shape: f32[2,1024], index: 2, kind: input, shape index: {}]   ;;  %s209_s3 = inlined_call_operand.hbm [shape: f32[2,3584], index: 3, kind: output, shape index: {}]  }
   0x1   :  { %9 = vsyncpa [#allocation6], 0 }
   0x2   :  { %10 = vsyncpa [#allocation4], 0  ;;  %s170_s12 = smov [#allocation5]   ;;  %s171_s14 = smov [#allocation2]  }
   0x3   :  { %s27_s13 = sshll.u32 %s170_s12, 4  ;;  %s17_s15 = sshll.u32 %s171_s14, 4  ;;  %s28_s13 = int_to_ptr.vmem [resolvable:$true] %s27_s13  ;;  %s18_s15 = int_to_ptr.vmem [resolvable:$true] %s17_s15 }
   0x4   :  { %s92_s16 = scalar_lea.vmem %s28_s13, 384  ;;  %p97_p1 = scmp.lt.s32.totalorder %s28_s13, %s28_s13 }
   0x5   :  { %p93_p0 = scmp.ne.s32.totalorder %s28_s13, %s92_s16  ;;  %p98_p2 = scmp.lt.s32.totalorder %s92_s16, %s92_s16 }
   0x7   :  { %p99_p3 = por %p98_p2, %p97_p1 }
   0x9   :  { %p100_p4 = pnand %p99_p3, %p93_p0 }
   0xb   :  { %103 = shalt.err (!%p100_p4)
}
   0xc   :  { %30 = dma.hbm_to_vmem [thread:$0]  %s207_s1, 384, %s28_s13, [#allocation6]  }
   0xd   :  { %s112_s19 = scalar_lea.vmem %s18_s15, 256  ;;  %p117_p6 = scmp.lt.s32.totalorder %s18_s15, %s18_s15 }
   0xe   :  { %p113_p5 = scmp.ne.s32.totalorder %s18_s15, %s112_s19  ;;  %p118_p7 = scmp.lt.s32.totalorder %s112_s19, %s112_s19 }
  0x10   :  { %p119_p8 = por %p118_p7, %p117_p6 }
  0x12   :  { %p120_p9 = pnand %p119_p8, %p113_p5 }
  0x14   :  { %123 = shalt.err (!%p120_p9)
}
  0x15   :  { %20 = dma.hbm_to_vmem [thread:$0]  %s206_s0, 256, %s18_s15, [#allocation3]  }
  0x16   :  { %s172_s22 = smov [#allocation7]  }
  0x17   :  { %s37_s23 = sshll.u32 %s172_s22, 4  ;;  %s38_s23 = int_to_ptr.vmem [resolvable:$true] %s37_s23 }
  0x18   :  { %s132_s24 = scalar_lea.vmem %s38_s23, 256  ;;  %p137_p11 = scmp.lt.s32.totalorder %s38_s23, %s38_s23 }
  0x19   :  { %p133_p10 = scmp.ne.s32.totalorder %s38_s23, %s132_s24  ;;  %p138_p12 = scmp.lt.s32.totalorder %s132_s24, %s132_s24 }
  0x1b   :  { %p139_p13 = por %p138_p12, %p137_p11 }
  0x1d   :  { %p140_p0 = pnand %p139_p13, %p133_p10 }
  0x1f   :  { %143 = shalt.err (!%p140_p0)
}
  0x20   :  { %40 = dma.hbm_to_vmem [thread:$0]  %s208_s2, 256, %s38_s23, [#allocation6]  }
  0x21   :  { %164 = dma.done.wait [#allocation3], 256  }
  0x22   :  { %165 = vsyncadd [#allocation3], 4294967040 }
  0x23   :  { %166 = dma.done.wait [#allocation6], 640  }
  0x24   :  { %167 = vsyncadd [#allocation6], 4294966656  ;;  %s173_s26 = smov [#allocation8]   ;;  %v50_v0 = vld [vmem:[#allocation2] sm:$0xff]  ;;  %v51_v1 = vld [vmem:[#allocation2 + $0x8] sm:$0xff] }
  0x25   :  { %s70_s0 = sshll.u32 %s173_s26, 4  ;;  %v54_v2 = vld [vmem:[#allocation5] sm:$0xff]  ;;  %52 = vst [vmem:[#allocation8] sm:$0xff] %v50_v0  ;;  %53 = vst [vmem:[#allocation8 + $0x8] sm:$0xff] %v51_v1  ;;  %v55_v3 = vld [vmem:[#allocation5 + $0x8] sm:$0xff]  ;;  %s71_s0 = int_to_ptr.vmem [resolvable:$true] %s70_s0 }
  0x26   :  { %57 = vst [vmem:[#allocation8 + $0x10] sm:$0xff] %v54_v2  ;;  %v56_v4 = vld [vmem:[#allocation5 + $0x10] sm:$0xff]  ;;  %v60_v5 = vld [vmem:[#allocation7] sm:$0xff]  ;;  %58 = vst [vmem:[#allocation8 + $0x18] sm:$0xff] %v55_v3  ;;  %s144_s2 = scalar_lea.vmem %s71_s0, 896  ;;  %p149_p2 = scmp.lt.s32.totalorder %s71_s0, %s71_s0 }
  0x27   :  { %59 = vst [vmem:[#allocation8 + $0x20] sm:$0xff] %v56_v4  ;;  %62 = vst [vmem:[#allocation8 + $0x28] sm:$0xff] %v60_v5  ;;  %v61_v6 = vld [vmem:[#allocation7 + $0x8] sm:$0xff]  ;;  %p145_p1 = scmp.ne.s32.totalorder %s71_s0, %s144_s2  ;;  %p150_p3 = scmp.lt.s32.totalorder %s144_s2, %s144_s2 }
  0x28   :  { %63 = vst [vmem:[#allocation8 + $0x30] sm:$0xff] %v61_v6 }
  0x29   :  { %p151_p4 = por %p150_p3, %p149_p2 }
  0x2b   :  { %p152_p5 = pnand %p151_p4, %p145_p1 }
  0x2d   :  { %155 = shalt.err (!%p152_p5)
}
  0x2e   :  { %73 = dma.vmem_to_hbm [thread:$0]  %s71_s0, 896, %s209_s3, [#allocation4]  }
  0x2f   :  { %168 = dma.done.wait [#allocation4], 896  }
  0x30   :  { %169 = vsyncadd [#allocation4], 4294966400 }
  0x31   :  { %77 = vsyncpa [#allocation3], 1 }
  0x32   :  { %78 = vsyncpa [#allocation6], 1 }
  0x33   :  { %79 = vsyncpa [#allocation4], 1 }

</bundles_post_ra>
